<compile_context>
chip_gen: v5e
topology: v5e:2x2
jax: 0.10.0
libtpu: 0.0.40
codegen_flags: <defaults>
</compile_context>

<pallas_src>
import jax
import jax.numpy as jnp
from jax.experimental import pallas as pl
from jax.experimental.pallas import tpu as pltpu


def attention_kernel(enc_ref, hidp_ref, w_enc_ref, v_ref, out_ref):
    # enc_ref:   (TB, S, H)  encoder_outputs tile
    # hidp_ref:  (TB, 1, H)  hidden @ W_hid^T + bias, precomputed per batch row
    # w_enc_ref: (H, H)      encoder half of the attn weight, (in, out) layout
    # v_ref:     (1, 1, H)   v weight as a broadcastable row
    # out_ref:   (TB, S)     softmax over the sequence axis (lane-dense)
    TB, S, H = enc_ref.shape

    # One row-batched MXU matmul: (TB*S, H) x (H, H).
    # (S == 8 keeps this collapse sublane-tile aligned, i.e. a layout no-op.)
    pre = jnp.dot(
        enc_ref[...].reshape(TB * S, H),
        w_enc_ref[...],
        preferred_element_type=jnp.float32,
    )

    # Add the bias-folded hidden projection, broadcast over the S axis.
    energy = jnp.tanh(pre.reshape(TB, S, H) + hidp_ref[...])        # (TB, S, H)

    # v-projection as VPU mul + cross-lane reduce instead of an N=1 matmul;
    # result is (TB, S) with S on lanes -> lane-axis softmax below.
    scores = jnp.sum(energy * v_ref[...], axis=-1)                  # (TB, S)

    # Numerically stable softmax over the sequence (lane) axis.
    m = jnp.max(scores, axis=-1, keepdims=True)
    e = jnp.exp(scores - m)
    out_ref[...] = (e / jnp.sum(e, axis=-1, keepdims=True)).astype(out_ref.dtype)


def _pick_tile_b(B, S, H, itemsize=4, vmem_budget_bytes=8 * 1024 * 1024):
    """Largest divisor of B whose double-buffered encoder tile + f32 energy
    intermediate stays well inside scoped VMEM (conservative for v7x/v5e)."""
    best = 1
    lanes = max(H, 128)  # lane padding
    for t in range(1, B + 1):
        if B % t:
            continue
        need = t * S * lanes * (2 * itemsize + 4)
        if need <= vmem_budget_bytes:
            best = t
    return best


def attention_forward(hidden, encoder_outputs, w_attn, b_attn, v_w, *, tile_b=None):
    """hidden: (1, B, 2H), encoder_outputs: (B, S, H) -> (B, S) softmax weights."""
    B, S, H = encoder_outputs.shape
    two_h = hidden.shape[-1]

    # Split the PyTorch (H, 3H) weight (out, in) into hidden / encoder halves so
    # the repeated-hidden concat never hits HBM.
    w_hid = w_attn[:, :two_h]                         # (H, 2H)
    w_enc_t = jnp.transpose(w_attn[:, two_h:])        # (H, H) as (in, out)

    # Tiny per-batch hidden projection with the bias folded in (plain JAX).
    hid_proj = (hidden[0] @ jnp.transpose(w_hid) + b_attn)[:, None, :]  # (B, 1, H)

    v_row = v_w.reshape(1, 1, H)                      # (1, 1, H)

    if tile_b is None:
        tile_b = _pick_tile_b(B, S, H, encoder_outputs.dtype.itemsize)
    assert B % tile_b == 0, "tile_b must divide B"
    grid = (B // tile_b,)   # toy shapes: (1,) -> single grid step

    out = pl.pallas_call(
        attention_kernel,
        out_shape=jax.ShapeDtypeStruct((B, S), jnp.float32),
        grid_spec=pltpu.PrefetchScalarGridSpec(
            num_scalar_prefetch=0,
            grid=grid,
            in_specs=[
                pl.BlockSpec((tile_b, S, H), lambda b: (b, 0, 0)),
                pl.BlockSpec((tile_b, 1, H), lambda b: (b, 0, 0)),
                pl.BlockSpec((H, H), lambda b: (0, 0)),
                pl.BlockSpec((1, 1, H), lambda b: (0, 0, 0)),
            ],
            out_specs=pl.BlockSpec((tile_b, S), lambda b: (b, 0)),
        ),
        compiler_params=pltpu.CompilerParams(
            dimension_semantics=("parallel",),
        ),
    )(encoder_outputs, hid_proj, w_enc_t, v_row)

    return out  # (B, S)


def _reference(hidden, encoder_outputs, w_attn, b_attn, v_w):
    B, S, H = encoder_outputs.shape
    hid = jnp.broadcast_to(jnp.transpose(hidden, (1, 0, 2)),
                           (B, S, hidden.shape[-1]))
    combined = jnp.concatenate([hid, encoder_outputs], axis=-1)
    energy = jnp.tanh(jnp.einsum("bsk,hk->bsh", combined, w_attn) + b_attn)
    attn = jnp.einsum("bsh,oh->bso", energy, v_w)[..., 0]
    return jax.nn.softmax(attn, axis=1)


if __name__ == "__main__":
    # small shapes consistent with the module: B=2, S=8, hidden_size H=32
    B, S, H = 2, 8, 32
    key = jax.random.PRNGKey(0)
    k_hid, k_enc, k_w, k_b, k_v = jax.random.split(key, 5)

    hidden = jax.random.normal(k_hid, (1, B, 2 * H), dtype=jnp.float32)
    encoder_outputs = jax.random.normal(k_enc, (B, S, H), dtype=jnp.float32)

    # deterministic PyTorch-Linear-style init: U(-1/sqrt(fan_in), 1/sqrt(fan_in))
    bound_attn = 1.0 / (3 * H) ** 0.5
    w_attn = jax.random.uniform(k_w, (H, 3 * H), jnp.float32,
                                minval=-bound_attn, maxval=bound_attn)
    b_attn = jax.random.uniform(k_b, (H,), jnp.float32,
                                minval=-bound_attn, maxval=bound_attn)
    bound_v = 1.0 / H ** 0.5
    v_w = jax.random.uniform(k_v, (1, H), jnp.float32,
                             minval=-bound_v, maxval=bound_v)

    out = attention_forward(hidden, encoder_outputs, w_attn, b_attn, v_w)
    out = jax.block_until_ready(out)

    ref = _reference(hidden, encoder_outputs, w_attn, b_attn, v_w)
    assert out.shape == (B, S)
    assert jnp.allclose(out, ref, atol=1e-5, rtol=1e-5)
    assert jnp.allclose(jnp.sum(out, axis=1), jnp.ones((B,)), atol=1e-5)

    print("KERNEL_OK")
</pallas_src>

<mosaic_0001>
module attributes {stable_mosaic.version = 11 : i64} {
  func.func @attention_kernel(%arg0: i32, %arg1: memref<2x8x32xf32, #tpu.memory_space<vmem>>, %arg2: memref<2x1x32xf32, #tpu.memory_space<vmem>>, %arg3: memref<32x32xf32, #tpu.memory_space<vmem>>, %arg4: memref<1x1x32xf32, #tpu.memory_space<vmem>>, %arg5: memref<2x8xf32, #tpu.memory_space<vmem>>) attributes {dimension_semantics = [#tpu.dimension_semantics<parallel>], iteration_bounds = array<i64: 1>, scalar_prefetch = 0 : i64, scratch_operands = 0 : i64, tpu.core_type = #tpu.core_type<tc>, window_params = [{transform_indices = @transform_0, window_bounds = array<i64: 2, 8, 32>}, {transform_indices = @transform_1, window_bounds = array<i64: 2, 1, 32>}, {pipeline_mode = #tpu.pipeline_mode<synchronous>, transform_indices = @transform_2, window_bounds = array<i64: 32, 32>}, {pipeline_mode = #tpu.pipeline_mode<synchronous>, transform_indices = @transform_3, window_bounds = array<i64: 1, 1, 32>}, {transform_indices = @transform_4, window_bounds = array<i64: 2, 8>}]} {
    %c0 = arith.constant 0 : index
    %c0_0 = arith.constant 0 : index
    %c0_1 = arith.constant 0 : index
    %0 = vector.load %arg1[%c0, %c0_0, %c0_1] : memref<2x8x32xf32, #tpu.memory_space<vmem>>, vector<2x8x32xf32>
    %1 = vector.shape_cast %0 : vector<2x8x32xf32> to vector<16x32xf32>
    %c0_2 = arith.constant 0 : index
    %c0_3 = arith.constant 0 : index
    %2 = vector.load %arg3[%c0_2, %c0_3] : memref<32x32xf32, #tpu.memory_space<vmem>>, vector<32x32xf32>
    %cst = arith.constant dense<0.000000e+00> : vector<16x32xf32>
    %3 = tpu.matmul %1, %2, %cst {dimension_numbers = #tpu.dot_dimension_numbers<[1], [0], [0], [1], [0, 0, 1, 1], [], []>} : vector<16x32xf32>, vector<32x32xf32>, vector<16x32xf32> -> vector<16x32xf32>
    %4 = vector.shape_cast %3 : vector<16x32xf32> to vector<2x8x32xf32>
    %c0_4 = arith.constant 0 : index
    %c0_5 = arith.constant 0 : index
    %c0_6 = arith.constant 0 : index
    %5 = vector.load %arg2[%c0_4, %c0_5, %c0_6] : memref<2x1x32xf32, #tpu.memory_space<vmem>>, vector<2x1x32xf32>
    %6 = vector.broadcast %5 : vector<2x1x32xf32> to vector<2x8x32xf32>
    %7 = arith.addf %4, %6 : vector<2x8x32xf32>
    %8 = math.tanh %7 : vector<2x8x32xf32>
    %c0_7 = arith.constant 0 : index
    %c0_8 = arith.constant 0 : index
    %c0_9 = arith.constant 0 : index
    %9 = vector.load %arg4[%c0_7, %c0_8, %c0_9] : memref<1x1x32xf32, #tpu.memory_space<vmem>>, vector<1x1x32xf32>
    %10 = vector.broadcast %9 : vector<1x1x32xf32> to vector<2x8x32xf32>
    %11 = arith.mulf %8, %10 : vector<2x8x32xf32>
    %cst_10 = arith.constant dense<0.000000e+00> : vector<2x8xf32>
    %12 = vector.multi_reduction <add>, %11, %cst_10 [2] : vector<2x8x32xf32> to vector<2x8xf32>
    %cst_11 = arith.constant dense<0xFF800000> : vector<2xf32>
    %13 = vector.multi_reduction <maximumf>, %12, %cst_11 [1] : vector<2x8xf32> to vector<2xf32>
    %14 = vector.shape_cast %13 : vector<2xf32> to vector<2x1xf32>
    %15 = vector.broadcast %14 : vector<2x1xf32> to vector<2x8xf32>
    %16 = arith.subf %12, %15 : vector<2x8xf32>
    %17 = math.exp %16 : vector<2x8xf32>
    %cst_12 = arith.constant dense<0.000000e+00> : vector<2xf32>
    %18 = vector.multi_reduction <add>, %17, %cst_12 [1] : vector<2x8xf32> to vector<2xf32>
    %19 = vector.shape_cast %18 : vector<2xf32> to vector<2x1xf32>
    %20 = vector.broadcast %19 : vector<2x1xf32> to vector<2x8xf32>
    %21 = arith.divf %17, %20 : vector<2x8xf32>
    %c0_13 = arith.constant 0 : index
    %c0_14 = arith.constant 0 : index
    %22 = vector.load %arg5[%c0_13, %c0_14] : memref<2x8xf32, #tpu.memory_space<vmem>>, vector<2x8xf32>
    tpu.vector_store %arg5[%c0_13, %c0_14], %21 {strides = array<i32>} : memref<2x8xf32, #tpu.memory_space<vmem>>, vector<2x8xf32>,
    return
  }
  func.func @transform_0(%arg0: i32) -> (i32, i32, i32) {
    %c0_i32 = arith.constant 0 : i32
    %c0_i32_0 = arith.constant 0 : i32
    %c0_i32_1 = arith.constant 0 : i32
    return %arg0, %c0_i32, %c0_i32_0 : i32, i32, i32
  }
  func.func @transform_1(%arg0: i32) -> (i32, i32, i32) {
    %c0_i32 = arith.constant 0 : i32
    %c0_i32_0 = arith.constant 0 : i32
    %c0_i32_1 = arith.constant 0 : i32
    return %arg0, %c0_i32, %c0_i32_0 : i32, i32, i32
  }
  func.func @transform_2(%arg0: i32) -> (i32, i32) {
    %c0_i32 = arith.constant 0 : i32
    %c0_i32_0 = arith.constant 0 : i32
    %c0_i32_1 = arith.constant 0 : i32
    return %c0_i32, %c0_i32_0 : i32, i32
  }
  func.func @transform_3(%arg0: i32) -> (i32, i32, i32) {
    %c0_i32 = arith.constant 0 : i32
    %c0_i32_0 = arith.constant 0 : i32
    %c0_i32_1 = arith.constant 0 : i32
    %c0_i32_2 = arith.constant 0 : i32
    return %c0_i32, %c0_i32_0, %c0_i32_1 : i32, i32, i32
  }
  func.func @transform_4(%arg0: i32) -> (i32, i32) {
    %c0_i32 = arith.constant 0 : i32
    %c0_i32_0 = arith.constant 0 : i32
    return %arg0, %c0_i32 : i32, i32
  }
}

</mosaic_0001>

<bundles_post_ra>
// kernel: tpu_custom_call.1
= control target key start
LH: loop header
LB: loop body
LE: loop exit
PB: predicated region body
PF: predicated region fallthrough
CT: control target
= control target key end

     0   :  { %9 = vsyncpa [#allocation3], 0  ;;  %s432_s0 = inlined_call_operand.hbm [shape: f32[2,8,32], index: 0, kind: input, shape index: {}]   ;;  %s433_s1 = inlined_call_operand.hbm [shape: f32[2,1,32], index: 1, kind: input, shape index: {}]   ;;  %s434_s2 = inlined_call_operand.hbm [shape: f32[32,32], index: 2, kind: input, shape index: {}]   ;;  %s435_s3 = inlined_call_operand.vmem [shape: f32[1,1,32], index: 3, kind: input, shape index: {}]   ;;  %s436_s4 = inlined_call_operand.hbm [shape: f32[2,8], index: 4, kind: output, shape index: {}]  }
   0x1   :  { %10 = vsyncpa [#allocation6], 0  ;;  %s29_s17 = sshll.u32 %s433_s1, 4  ;;  %s30_s17 = int_to_ptr.hbm [resolvable:$true] %s29_s17 }
   0x2   :  { %11 = vsyncpa [#allocation4], 0  ;;  %s365_s18 = smov [#allocation5]   ;;  %s16_s22 = sshll.u32 %s432_s0, 4  ;;  %s17_s22 = int_to_ptr.hbm [resolvable:$true] %s16_s22 }
   0x3   :  { %s31_s19 = sshll.u32 %s365_s18, 4  ;;  %s366_s23 = smov 16   ;;  %s32_s19 = int_to_ptr.vmem [resolvable:$true] %s31_s19 }
   0x4   :  { %s367_s24 = smov 1   ;;  %s368_s25 = smov [#allocation2]  }
   0x5   :  { %37 = dma.hbm_to_vmem [thread:$0]  %s30_s17, 32, %s32_s19, [#allocation6], %s366_s23, %s366_s23, %s367_s24  }
   0x6   :  { %s18_s26 = sshll.u32 %s368_s25, 4  ;;  %s369_s27 = smov 128   ;;  %s19_s26 = int_to_ptr.vmem [resolvable:$true] %s18_s26 }
   0x7   :  { %s370_s28 = smov 8   ;;  %s42_s30 = sshll.u32 %s434_s2, 4  ;;  %s43_s30 = int_to_ptr.hbm [resolvable:$true] %s42_s30 }
   0x8   :  { %24 = dma.hbm_to_vmem [thread:$0]  %s17_s22, 256, %s19_s26, [#allocation3], %s369_s27, %s369_s27, %s370_s28  }
   0x9   :  { %s371_s5 = smov [#allocation7]  }
   0xa   :  { %s44_s6 = sshll.u32 %s371_s5, 4  ;;  %s45_s6 = int_to_ptr.vmem [resolvable:$true] %s44_s6 }
   0xb   :  { %50 = dma.hbm_to_vmem [thread:$0]  %s43_s30, 512, %s45_s6, [#allocation6], %s369_s27, %s369_s27, %s370_s28  }
   0xc   :  { %359 = dma.done.wait [#allocation3], 256  }
   0xd   :  { %360 = vsyncadd [#allocation3], 4294967040 }
   0xe   :  { %361 = dma.done.wait [#allocation6], 544  }
   0xf   :  { %362 = vsyncadd [#allocation6], 4294966752  ;;  %v70_v0 = vld [vmem:[#allocation7 + $0x18] sm:$0xff]  ;;  %v69_v1 = vld [vmem:[#allocation7 + $0x10] sm:$0xff]  ;;  %vm71_vm0 = vcmask 261120   ;;  %v127_v20 = vlaneseq  ;;  %vm131_vm1 = vcmask 1041409  }
  0x10   :  { %90 = vmatpush.msra.mxu0 %v70_v0  ;;  %v68_v2 = vld [vmem:[#allocation7 + $0x8] sm:$0xff]  ;;  %232 = vmatpush.msra.mxu1 %v70_v0  ;;  %v67_v3 = vld [vmem:[#allocation7] sm:$0xff]  ;;  %v66_v5 = vld [vmem:[#allocation2 + $0x8] sm:$0xff]  ;;  %vm134_vm2 = vcmask 58368   ;;  %v372_v27 = vmov 0   ;;  %s219_s10 = sshll.u32 %s436_s4, 4  ;;  %s220_s10 = int_to_ptr.hbm [resolvable:$true] %s219_s10 }
  0x11   :  { %v65_v4 = vld [vmem:[#allocation2] sm:$0xff]  ;;  %v248_v6 = vld [vmem:[#allocation5] ss:$0 sm:$0xff]  ;;  %v249_v7 = vld [vmem:[#allocation5 + $0x1] ss:$0 sm:$0xff]  ;;  %v415_v21 = vand.u32 127, %v127_v20  ;;  %246 = vset.pattern.permute.xlu2 %v372_v27  ;;  %245 = vset.pattern.permute.xlu1 %v372_v27 }
  0x12   :  { %91 = vmatpush.msra.mxu0 %v69_v1  ;;  %233 = vmatpush.msra.mxu1 %v69_v1  ;;  %v250_v12 = vld [vmem:[%s435_s3] ss:$0 sm:$0xff]  ;;  %s373_s3 = smov [#allocation8]  }
  0x13   :  { %247 = vset.pattern.permute.xlu0 %v372_v27  ;;  %s217_s7 = sshll.u32 %s373_s3, 4  ;;  %s218_s7 = int_to_ptr.vmem [resolvable:$true] %s217_s7 }
  0x14   :  { %92 = vmatpush.msra.mxu0 %v68_v2  ;;  %234 = vmatpush.msra.mxu1 %v68_v2 }
  0x16   :  { %93 = vmatpush.msra.mxu0 %v67_v3  ;;  %235 = vmatpush.msra.mxu1 %v67_v3 }
  0x17   :  { %230 = vmatmul.msk.f32.vlgmr.msra.gmra.mxu0 %vm71_vm0, %v65_v4  ;;  %231 = vmatmul.msk.f32.vlgmr.msra.gmra.mxu1 %vm71_vm0, %v66_v5 }
  0x94   :  { %v95_v8 = vpop.f32.mrf.mxu0  ;;  %v98_v9 = vpop.f32.mrf.mxu1 }
  0x95   :  { %v109_v10 = vadd.f32 %v248_v6, %v95_v8  ;;  %v110_v11 = vadd.f32 %v249_v7, %v98_v9 }
  0x97   :  { %251 = vtanh.f32 %v109_v10 }
  0x98   :  { %253 = vtanh.f32 %v110_v11 }
  0x9d   :  { %v252_v13 = vpop.eup %251 }
  0x9e   :  { %v117_v14 = vmul.f32 %v252_v13, %v250_v12  ;;  %v254_v15 = vpop.eup %253 }
  0x9f   :  { %v118_v17 = vmul.f32 %v254_v15, %v250_v12 }
  0xa0   :  { %v119_v16 = vsel %vm71_vm0, %v117_v14, 0.0 }
  0xa1   :  { %120 = vadd.xlane.f32.xlu0 %v119_v16  ;;  %v122_v18 = vsel %vm71_vm0, %v118_v17, 0.0 }
  0xa9   :  { %123 = vadd.xlane.f32.xlu0 %v122_v18 }
 0x114   :  { %v121_v19 = vpop.xlane.xlu0 %120 }
 0x115   :  { %v129_v23 = vperm.slane %v121_v19, %v415_v21 }
 0x11c   :  { %v124_v22 = vpop.xlane.xlu0 %123 }
 0x11d   :  { %v130_v24 = vperm.slane %v124_v22, %v415_v21 }
 0x11f   :  { %v132_v25 = vsel %vm131_vm1, %v130_v24, %v129_v23 }
 0x120   :  { %v135_v26 = vsel %vm134_vm2, %v132_v25, -inf }
 0x121   :  { %136 = vmax.xlane.f32.xlu1 %v135_v26 }
 0x194   :  { %v137_v28 = vpop.xlane.xlu1 %136 }
 0x195   :  { %v139_v29 = vperm.slane %v137_v28, 0  ;;  %v140_v30 = vperm.slane %v137_v28, 1 }
 0x197   :  { %v143_v31 = vsub.f32 %v121_v19, %v139_v29  ;;  %v144_v32 = vsub.f32 %v124_v22, %v140_v30 }
 0x199   :  { %v145_v33 = vmul.f32 1.442695, %v143_v31  ;;  %v147_v34 = vmul.f32 1.442695, %v144_v32 }
 0x19b   :  { %255 = vpow2.f32 %v145_v33 }
 0x19c   :  { %257 = vpow2.f32 %v147_v34 }
 0x1a1   :  { %v256_v35 = vpop.eup %255 }
 0x1a2   :  { %v258_v36 = vpop.eup %257  ;;  %152 = vperm.xlu1 %245, %v256_v35  }
 0x1a3   :  { %155 = vperm.xlu2 %246, %v258_v36  }
 0x1fd   :  { %v156_v37 = vpop.permute.xlu2 %155 }
 0x1fe   :  { %v158_v39 = vperm.slane %v156_v37, %v415_v21 }
 0x214   :  { %v153_v38 = vpop.permute.xlu1 %152 }
 0x215   :  { %v157_v40 = vperm.slane %v153_v38, %v415_v21 }
 0x217   :  { %v159_v41 = vsel %vm131_vm1, %v158_v39, %v157_v40 }
 0x218   :  { %v161_v42 = vsel %vm134_vm2, %v159_v41, 0.0 }
 0x219   :  { %162 = vadd.xlane.f32.xlu2 %v161_v42 }
 0x28c   :  { %v163_v43 = vpop.xlane.xlu2 %162 }
 0x28d   :  { %v165_v44 = vperm.slane %v163_v43, 0  ;;  %v166_v45 = vperm.slane %v163_v43, 1 }
 0x28f   :  { %259 = vrcp.f32 %v165_v44  ;;  %v180_v52 = vand.u32 2147483648, %v165_v44  ;;  %v195_v53 = vand.u32 2147483648, %v166_v45  ;;  %v178_v55 = vand.u32 2147483647, %v165_v44 }
 0x290   :  { %261 = vrcp.f32 %v166_v45  ;;  %v193_v57 = vand.u32 2147483647, %v166_v45  ;;  %vm174_vm5 = vweird.f32 %v165_v44  ;;  %vm189_vm6 = vweird.f32 %v166_v45 }
 0x291   :  { %v181_v60 = vor.u32 1.1754944e-38, %v180_v52  ;;  %v196_v61 = vor.u32 1.1754944e-38, %v195_v53  ;;  %vm179_vm9 = vcmp.eq.f32.partialorder %v178_v55, 8.507059e+37 }
 0x292   :  { %vm194_vm10 = vcmp.eq.f32.partialorder %v193_v57, 8.507059e+37 }
 0x295   :  { %v260_v46 = vpop.eup %259 }
 0x296   :  { %v262_v47 = vpop.eup %261  ;;  %v170_v48 = vmul.f32 %v260_v46, %v165_v44  ;;  %vm175_vm3 = vweird.f32 %v260_v46 }
 0x297   :  { %v185_v49 = vmul.f32 %v262_v47, %v166_v45  ;;  %vm190_vm4 = vweird.f32 %v262_v47  ;;  %vm176_vm7 = vmor %vm174_vm5, %vm175_vm3 }
 0x298   :  { %v171_v50 = vsub.f32 1.0, %v170_v48  ;;  %vm191_vm8 = vmor %vm189_vm6, %vm190_vm4 }
 0x299   :  { %v186_v51 = vsub.f32 1.0, %v185_v49 }
 0x29a   :  { %v172_v54 = vmul.f32 %v260_v46, %v171_v50 }
 0x29b   :  { %v187_v56 = vmul.f32 %v262_v47, %v186_v51 }
 0x29c   :  { %v173_v58 = vadd.f32 %v260_v46, %v172_v54 }
 0x29d   :  { %v188_v59 = vadd.f32 %v262_v47, %v187_v56 }
 0x29e   :  { %v177_v62 = vsel %vm176_vm7, %v260_v46, %v173_v58 }
 0x29f   :  { %v192_v63 = vsel %vm191_vm8, %v262_v47, %v188_v59  ;;  %v182_v0 = vsel %vm179_vm9, %v181_v60, %v177_v62 }
 0x2a0   :  { %v197_v1 = vsel %vm194_vm10, %v196_v61, %v192_v63  ;;  %v183_v2 = vmul.f32 %v256_v35, %v182_v0 }
 0x2a1   :  { %v198_v3 = vmul.f32 %v258_v36, %v197_v1 }
 0x2a2   :  { %202 = vperm.xlu0 %247, %v183_v2  }
 0x2a3   :  { %205 = vperm.xlu1 %245, %v198_v3  }
 0x314   :  { %v203_v4 = vpop.permute.xlu0 %202 }
 0x315   :  { %v206_v5 = vpop.permute.xlu1 %205  ;;  %v207_v6 = vperm.slane %v203_v4, %v415_v21 }
 0x316   :  { %v208_v7 = vperm.slane %v206_v5, %v415_v21 }
 0x318   :  { %v209_v8 = vsel %vm131_vm1, %v208_v7, %v207_v6 }
 0x319   :  { %211 = vst.msk [vmem:[#allocation8] sm:$0x3] %vm134_vm2, %v209_v8 }
 0x31a   :  { %222 = dma.vmem_to_hbm [thread:$0]  %s218_s7, 32, %s220_s10, [#allocation4]  }
 0x31b   :  { %363 = dma.done.wait [#allocation4], 32  }
 0x31c   :  { %364 = vsyncadd [#allocation4], 4294967264 }
 0x31d   :  { %227 = vsyncpa [#allocation3], 1 }
 0x31e   :  { %228 = vsyncpa [#allocation6], 1 }
 0x31f   :  { %229 = vsyncpa [#allocation4], 1 }

</bundles_post_ra>
